<compile_context>
chip_gen: v7x
topology: tpu7x:2x2x1
jax: 0.10.0
libtpu: 0.0.40
codegen_flags: <defaults>
</compile_context>

<pallas_src>
import jax
import jax.numpy as jnp
from jax import lax
from jax.experimental import pallas as pl
from jax.experimental.pallas import tpu as pltpu


def _round_up(x, m):
    return ((x + m - 1) // m) * m


# ---------------------------------------------------------------------------
# Kernel
# ---------------------------------------------------------------------------
def _make_mlp_kernel(n_hidden, in_dim, vpu_first, apply_sigmoid, out_dim):
    """Fused feature-major MLP kernel over one (features, TB) column tile.

    Ref order: x_ref, [w_i, b_i] * n_hidden, w_out, b_out, out_ref
      x_ref  : (in_dim, TB)          batch on the lane axis (lane-dense)
      w_i    : (hidden_pad, d_in)    BN-folded, transposed, zero-padded (VMEM resident)
      b_i    : (hidden_pad, 1)       BN-folded bias, f32
      w_out  : (out_dim, hidden_pad)
      b_out  : (out_dim, 1)          f32
      out_ref: (out_dim, TB)         lane-dense output tile
    """

    def kernel(x_ref, *refs):
        out_ref = refs[-1]
        x = x_ref[...]                                       # (in_dim, TB)

        # ---- Layer 0 ----
        w0 = refs[0][...]                                    # (hidden_pad, in_dim)
        b0 = refs[1][...]                                    # (hidden_pad, 1) f32
        if vpu_first:
            # in_dim < 8: a K<8 MXU contraction wastes the systolic array; compute the
            # outer product as VPU broadcast FMAs instead (frees the MXU/vex slot).
            xf = x.astype(jnp.float32)
            w0f = w0.astype(jnp.float32)
            h = w0f[:, 0:1] * xf[0:1, :]                     # (hidden_pad, TB)
            for k in range(1, in_dim):
                h = h + w0f[:, k:k + 1] * xf[k:k + 1, :]
            h = h + b0
        else:
            h = jnp.dot(w0, x.astype(w0.dtype),
                        preferred_element_type=jnp.float32) + b0
        h = jnp.maximum(h, 0.0)                              # ReLU (f32, VPU)

        # ---- Remaining hidden layers: MXU matmul, bias+ReLU in f32 on the VPU ----
        for i in range(1, n_hidden):
            w = refs[2 * i][...]                             # (hidden_pad, hidden_pad)
            b = refs[2 * i + 1][...]                         # (hidden_pad, 1) f32
            h = jnp.dot(w, h.astype(w.dtype),
                        preferred_element_type=jnp.float32) + b
            h = jnp.maximum(h, 0.0)

        # ---- Output layer (feature-major result: (out_dim, TB), lane-dense) ----
        w_out = refs[2 * n_hidden][...]                      # (out_dim, hidden_pad)
        b_out = refs[2 * n_hidden + 1][...]                  # (out_dim, 1) f32
        y = jnp.dot(w_out, h.astype(w_out.dtype),
                    preferred_element_type=jnp.float32) + b_out

        if apply_sigmoid:
            if out_dim == 1:
                y = jax.nn.sigmoid(y)                        # f32, EUP
            else:
                # Softmax over the output dim (torch dim=1 == axis 0 here).
                y = y - jnp.max(y, axis=0, keepdims=True)
                e = jnp.exp(y)
                y = e / jnp.sum(e, axis=0, keepdims=True)

        out_ref[...] = y.astype(out_ref.dtype)

    return kernel


# ---------------------------------------------------------------------------
# Parameter handling (deterministic init + eval-mode BN folding + 128 padding)
# ---------------------------------------------------------------------------
def init_net_params(key, in_dim=1, out_dim=1, num_layer=3, hidden_dim=100,
                    add_bn=True):
    """Deterministic parameters mirroring Net.__init__ (PyTorch-style init)."""
    dims = [in_dim] + [hidden_dim] * (num_layer - 1) + [out_dim]
    linears, bns = [], []
    for li in range(num_layer):
        key, kw, kb = jax.random.split(key, 3)
        fan_in = dims[li]
        bound = 1.0 / (float(fan_in) ** 0.5)
        w = jax.random.uniform(kw, (dims[li], dims[li + 1]), jnp.float32,
                               -bound, bound)
        b = jax.random.uniform(kb, (dims[li + 1],), jnp.float32, -bound, bound)
        linears.append((w, b))
        if add_bn and li < num_layer - 1:
            d = dims[li + 1]
            bns.append((jnp.ones((d,), jnp.float32),   # gamma
                        jnp.zeros((d,), jnp.float32),  # beta
                        jnp.zeros((d,), jnp.float32),  # running_mean
                        jnp.ones((d,), jnp.float32)))  # running_var
    return {"linears": linears, "bns": bns if add_bn else None}


def _fold_and_pad_params(params, add_bn, bn_eps, mxu_dtype):
    """Fold eval-mode BN into the Linears; transpose to feature-major; pad hidden->128."""
    linears = params["linears"]
    bns = params["bns"] if add_bn else None
    n_hidden = len(linears) - 1
    in_dim = linears[0][0].shape[0]
    hidden_dim = linears[0][0].shape[1]
    out_dim = linears[-1][0].shape[1]
    hp = _round_up(hidden_dim, 128)

    hidden_layers = []
    for idx in range(n_hidden):
        w, b = linears[idx]
        w = w.astype(jnp.float32)                            # (d_in, d_out)
        b = b.astype(jnp.float32)                            # (d_out,)
        if add_bn:
            gamma, beta, mean, var = (p.astype(jnp.float32) for p in bns[idx])
            s = gamma * lax.rsqrt(var + bn_eps)
            w = w * s[None, :]
            b = b * s + (beta - mean * s)
        wt = w.T                                             # (d_out, d_in)
        d_out, d_in = wt.shape
        d_in_pad = in_dim if idx == 0 else hp
        wt = jnp.pad(wt, ((0, hp - d_out), (0, d_in_pad - d_in)))
        bcol = jnp.pad(b, (0, hp - d_out)).reshape(hp, 1)
        # First layer stays f32 when it takes the VPU outer-product path.
        w_dtype = jnp.float32 if (idx == 0 and in_dim < 8) else mxu_dtype
        hidden_layers.append((wt.astype(w_dtype), bcol))

    w_last, b_last = linears[-1]
    w_out = jnp.pad(w_last.astype(jnp.float32).T,
                    ((0, 0), (0, hp - hidden_dim))).astype(mxu_dtype)  # (out_dim, hp)
    b_out = b_last.astype(jnp.float32).reshape(out_dim, 1)
    return hidden_layers, w_out, b_out, hp


# ---------------------------------------------------------------------------
# Pure-JAX reference (eval-mode BN) — also used as the tiny-batch fallback
# ---------------------------------------------------------------------------
def net_forward_ref(x, params, *, add_bn=True, sigmoid=False, bn_eps=1e-5):
    linears = params["linears"]
    bns = params["bns"] if add_bn else None
    h = x.astype(jnp.float32)
    hpmode = lax.Precision.HIGHEST
    for li, (w, b) in enumerate(linears[:-1]):
        h = jnp.dot(h, w, precision=hpmode) + b
        if add_bn:
            gamma, beta, mean, var = bns[li]
            h = (h - mean) * gamma / jnp.sqrt(var + bn_eps) + beta
        h = jnp.maximum(h, 0.0)
    w, b = linears[-1]
    y = jnp.dot(h, w, precision=hpmode) + b
    if sigmoid:
        y = jax.nn.sigmoid(y) if y.shape[1] == 1 else jax.nn.softmax(y, axis=1)
    return y.astype(x.dtype)


# ---------------------------------------------------------------------------
# Wrapper
# ---------------------------------------------------------------------------
def net_forward(x, params, *, add_bn=True, sigmoid=False, bn_eps=1e-5,
                block_rows=2048, min_pallas_batch=1024,
                mxu_dtype=jnp.bfloat16):
    """Pallas-backed Net.forward (BatchNorm in eval mode).

    Args:
      x: (B, in_dim) array.
      params: dict from init_net_params.
      block_rows: batch rows per grid step (clamped to a multiple of 128, >= 128).
      min_pallas_batch: below this batch size, let XLA fuse the tiny MLP directly
        (single-tile Pallas launch overhead dominates at toy batches).
      mxu_dtype: dtype of MXU matmul operands (bf16 default for v6e/v7x; accumulation
        and all elementwise work stay f32).
    Returns:
      (B, out_dim) array.
    """
    B, in_dim = x.shape

    if B < min_pallas_batch:
        # Tiny-batch fallback: plain XLA fuses the 3-layer MLP better than a
        # single-tile pallas_call.
        return net_forward_ref(x, params, add_bn=add_bn, sigmoid=sigmoid,
                               bn_eps=bn_eps)

    hidden_layers, w_out, b_out, _hidden_pad = _fold_and_pad_params(
        params, add_bn, bn_eps, mxu_dtype)
    out_dim = w_out.shape[0]
    n_hidden = len(hidden_layers)
    dtype = x.dtype

    # ---- Batch tiling: batch on the lane axis, TB a multiple of 128 ----------
    B128 = _round_up(B, 128)
    TB = min(int(block_rows), B128)
    if B128 >= 256:
        TB = min(TB, B128 // 2)          # G >= 2: shard "parallel" axis over v7x's 2 TCs
    TB = max(128, (TB // 128) * 128)     # multiple of 128 -> unmasked lane-dense stores
    B_pad = _round_up(B, TB)
    G = B_pad // TB

    xt = x.T                                                  # (in_dim, B) feature-major
    if B_pad != B:
        xt = jnp.pad(xt, ((0, 0), (0, B_pad - B)))

    kernel = _make_mlp_kernel(n_hidden, in_dim, in_dim < 8, sigmoid, out_dim)

    # x/out are tiled along the batch (lane) axis; every weight/bias uses a constant
    # index_map so it stays resident in VMEM across the whole grid (no per-step DMA).
    # NOTE: resident operands are still double-buffered by default; at hidden_pad=128
    # that is <0.2 MiB total, so single-buffering (pl.Buffered(1)) is not worth it here.
    in_specs = [pl.BlockSpec((in_dim, TB), lambda i: (0, i))]
    operands = [xt]
    for w, b in hidden_layers:
        in_specs.append(pl.BlockSpec(w.shape, lambda i: (0, 0)))
        in_specs.append(pl.BlockSpec(b.shape, lambda i: (0, 0)))
        operands += [w, b]
    in_specs.append(pl.BlockSpec(w_out.shape, lambda i: (0, 0)))
    in_specs.append(pl.BlockSpec(b_out.shape, lambda i: (0, 0)))
    operands += [w_out, b_out]

    out = pl.pallas_call(
        kernel,
        out_shape=jax.ShapeDtypeStruct((out_dim, B_pad), dtype),
        grid=(G,),
        in_specs=in_specs,
        out_specs=pl.BlockSpec((out_dim, TB), lambda i: (0, i)),
        compiler_params=pltpu.CompilerParams(
            dimension_semantics=("parallel",)),
    )(*operands)

    # (out_dim, B_pad) lane-dense slab -> (B, out_dim). Wrapper-side layout plumbing.
    return out[:, :B].T


if __name__ == "__main__":
    key = jax.random.PRNGKey(0)
    key, kpA, kpB, kpC, kxA, kxB, kxC = jax.random.split(key, 7)

    # ---- Net A: module defaults (in_dim=1, out_dim=1, num_layer=3), small hidden ----
    pA = init_net_params(kpA, in_dim=1, out_dim=1, num_layer=3, hidden_dim=32,
                         add_bn=True)
    xA = jax.random.normal(kxA, (16, 1), dtype=jnp.float32)
    refA = net_forward_ref(xA, pA)

    # Check 0: tiny-batch XLA fallback (default min_pallas_batch=1024).
    out0 = jax.block_until_ready(net_forward(xA, pA))
    assert out0.shape == (16, 1)
    assert jnp.allclose(out0, refA, atol=1e-5, rtol=1e-5)

    # Check 1: Pallas path, f32 MXU operands, VPU outer-product first layer (in_dim=1).
    out1 = jax.block_until_ready(
        net_forward(xA, pA, mxu_dtype=jnp.float32, min_pallas_batch=0))
    assert out1.shape == (16, 1)
    assert jnp.allclose(out1, refA, atol=5e-3, rtol=5e-3)

    # Check 2: sigmoid head (out_dim=1) on the same net.
    out2 = jax.block_until_ready(
        net_forward(xA, pA, sigmoid=True, mxu_dtype=jnp.float32, min_pallas_batch=0))
    ref2 = net_forward_ref(xA, pA, sigmoid=True)
    assert jnp.allclose(out2, ref2, atol=5e-3, rtol=5e-3)

    # ---- Net B: in_dim=8, hidden_dim=100 (pads to 128), multi-tile grid, bf16 MXU ----
    pB = init_net_params(kpB, in_dim=8, out_dim=1, num_layer=3, hidden_dim=100,
                         add_bn=True)
    xB = jax.random.normal(kxB, (300, 8), dtype=jnp.float32)
    out3 = jax.block_until_ready(
        net_forward(xB, pB, mxu_dtype=jnp.bfloat16, block_rows=128,
                    min_pallas_batch=0))
    ref3 = net_forward_ref(xB, pB)
    assert out3.shape == (300, 1)
    assert jnp.allclose(out3, ref3, atol=5e-2, rtol=5e-2)

    # ---- Net C: softmax head (out_dim=3), VPU first layer (in_dim=4) ----
    pC = init_net_params(kpC, in_dim=4, out_dim=3, num_layer=3, hidden_dim=32,
                         add_bn=True)
    xC = jax.random.normal(kxC, (16, 4), dtype=jnp.float32)
    out4 = jax.block_until_ready(
        net_forward(xC, pC, sigmoid=True, mxu_dtype=jnp.float32, min_pallas_batch=0))
    ref4 = net_forward_ref(xC, pC, sigmoid=True)
    assert out4.shape == (16, 3)
    assert jnp.allclose(out4, ref4, atol=5e-3, rtol=5e-3)

    print("KERNEL_OK")
</pallas_src>

<mosaic_0001>
module attributes {stable_mosaic.version = 11 : i64} {
  func.func @kernel(%arg0: i32, %arg1: memref<1x128xf32, #tpu.memory_space<vmem>>, %arg2: memref<128x1xf32, #tpu.memory_space<vmem>>, %arg3: memref<128x1xf32, #tpu.memory_space<vmem>>, %arg4: memref<128x128xf32, #tpu.memory_space<vmem>>, %arg5: memref<128x1xf32, #tpu.memory_space<vmem>>, %arg6: memref<1x128xf32, #tpu.memory_space<vmem>>, %arg7: memref<1x1xf32, #tpu.memory_space<vmem>>, %arg8: memref<1x128xf32, #tpu.memory_space<vmem>>) attributes {dimension_semantics = [#tpu.dimension_semantics<parallel>], iteration_bounds = array<i64: 1>, scalar_prefetch = 0 : i64, scratch_operands = 0 : i64, tpu.core_type = #tpu.core_type<tc>, window_params = [{transform_indices = @transform_0, window_bounds = array<i64: 1, 128>}, {pipeline_mode = #tpu.pipeline_mode<synchronous>, transform_indices = @transform_1, window_bounds = array<i64: 128, 1>}, {pipeline_mode = #tpu.pipeline_mode<synchronous>, transform_indices = @transform_2, window_bounds = array<i64: 128, 1>}, {pipeline_mode = #tpu.pipeline_mode<synchronous>, transform_indices = @transform_3, window_bounds = array<i64: 128, 128>}, {pipeline_mode = #tpu.pipeline_mode<synchronous>, transform_indices = @transform_4, window_bounds = array<i64: 128, 1>}, {pipeline_mode = #tpu.pipeline_mode<synchronous>, transform_indices = @transform_5, window_bounds = array<i64: 1, 128>}, {pipeline_mode = #tpu.pipeline_mode<synchronous>, transform_indices = @transform_6, window_bounds = array<i64: 1, 1>}, {transform_indices = @transform_7, window_bounds = array<i64: 1, 128>}]} {
    %c0 = arith.constant 0 : index
    %c0_0 = arith.constant 0 : index
    %0 = vector.load %arg1[%c0, %c0_0] : memref<1x128xf32, #tpu.memory_space<vmem>>, vector<1x128xf32>
    %c0_1 = arith.constant 0 : index
    %c0_2 = arith.constant 0 : index
    %1 = vector.load %arg2[%c0_1, %c0_2] : memref<128x1xf32, #tpu.memory_space<vmem>>, vector<128x1xf32>
    %c0_3 = arith.constant 0 : index
    %c0_4 = arith.constant 0 : index
    %2 = vector.load %arg3[%c0_3, %c0_4] : memref<128x1xf32, #tpu.memory_space<vmem>>, vector<128x1xf32>
    %3 = vector.broadcast %1 : vector<128x1xf32> to vector<128x128xf32>
    %4 = vector.broadcast %0 : vector<1x128xf32> to vector<128x128xf32>
    %5 = arith.mulf %3, %4 : vector<128x128xf32>
    %6 = vector.broadcast %2 : vector<128x1xf32> to vector<128x128xf32>
    %7 = arith.addf %5, %6 : vector<128x128xf32>
    %cst = arith.constant 0.000000e+00 : f32
    %8 = vector.broadcast %cst : f32 to vector<128x128xf32>
    %9 = arith.maximumf %7, %8 : vector<128x128xf32>
    %c0_5 = arith.constant 0 : index
    %c0_6 = arith.constant 0 : index
    %10 = vector.load %arg4[%c0_5, %c0_6] : memref<128x128xf32, #tpu.memory_space<vmem>>, vector<128x128xf32>
    %c0_7 = arith.constant 0 : index
    %c0_8 = arith.constant 0 : index
    %11 = vector.load %arg5[%c0_7, %c0_8] : memref<128x1xf32, #tpu.memory_space<vmem>>, vector<128x1xf32>
    %cst_9 = arith.constant dense<0.000000e+00> : vector<128x128xf32>
    %12 = tpu.matmul %10, %9, %cst_9 {dimension_numbers = #tpu.dot_dimension_numbers<[1], [0], [0], [1], [0, 0, 1, 1], [], []>} : vector<128x128xf32>, vector<128x128xf32>, vector<128x128xf32> -> vector<128x128xf32>
    %13 = vector.broadcast %11 : vector<128x1xf32> to vector<128x128xf32>
    %14 = arith.addf %12, %13 : vector<128x128xf32>
    %cst_10 = arith.constant 0.000000e+00 : f32
    %15 = vector.broadcast %cst_10 : f32 to vector<128x128xf32>
    %16 = arith.maximumf %14, %15 : vector<128x128xf32>
    %c0_11 = arith.constant 0 : index
    %c0_12 = arith.constant 0 : index
    %17 = vector.load %arg6[%c0_11, %c0_12] : memref<1x128xf32, #tpu.memory_space<vmem>>, vector<1x128xf32>
    %c0_13 = arith.constant 0 : index
    %c0_14 = arith.constant 0 : index
    %18 = vector.load %arg7[%c0_13, %c0_14] : memref<1x1xf32, #tpu.memory_space<vmem>>, vector<1x1xf32>
    %cst_15 = arith.constant dense<0.000000e+00> : vector<1x128xf32>
    %19 = tpu.matmul %17, %16, %cst_15 {dimension_numbers = #tpu.dot_dimension_numbers<[1], [0], [0], [1], [0, 0, 1, 1], [], []>} : vector<1x128xf32>, vector<128x128xf32>, vector<1x128xf32> -> vector<1x128xf32>
    %20 = vector.broadcast %18 : vector<1x1xf32> to vector<1x128xf32>
    %21 = arith.addf %19, %20 : vector<1x128xf32>
    %c0_16 = arith.constant 0 : index
    %c0_17 = arith.constant 0 : index
    %22 = vector.load %arg8[%c0_16, %c0_17] : memref<1x128xf32, #tpu.memory_space<vmem>>, vector<1x128xf32>
    tpu.vector_store %arg8[%c0_16, %c0_17], %21 {strides = array<i32>} : memref<1x128xf32, #tpu.memory_space<vmem>>, vector<1x128xf32>,
    return
  }
  func.func @transform_0(%arg0: i32) -> (i32, i32) {
    %c0_i32 = arith.constant 0 : i32
    %c0_i32_0 = arith.constant 0 : i32
    return %c0_i32, %arg0 : i32, i32
  }
  func.func @transform_1(%arg0: i32) -> (i32, i32) {
    %c0_i32 = arith.constant 0 : i32
    %c0_i32_0 = arith.constant 0 : i32
    %c0_i32_1 = arith.constant 0 : i32
    return %c0_i32, %c0_i32_0 : i32, i32
  }
  func.func @transform_2(%arg0: i32) -> (i32, i32) {
    %c0_i32 = arith.constant 0 : i32
    %c0_i32_0 = arith.constant 0 : i32
    %c0_i32_1 = arith.constant 0 : i32
    return %c0_i32, %c0_i32_0 : i32, i32
  }
  func.func @transform_3(%arg0: i32) -> (i32, i32) {
    %c0_i32 = arith.constant 0 : i32
    %c0_i32_0 = arith.constant 0 : i32
    %c0_i32_1 = arith.constant 0 : i32
    return %c0_i32, %c0_i32_0 : i32, i32
  }
  func.func @transform_4(%arg0: i32) -> (i32, i32) {
    %c0_i32 = arith.constant 0 : i32
    %c0_i32_0 = arith.constant 0 : i32
    %c0_i32_1 = arith.constant 0 : i32
    return %c0_i32, %c0_i32_0 : i32, i32
  }
  func.func @transform_5(%arg0: i32) -> (i32, i32) {
    %c0_i32 = arith.constant 0 : i32
    %c0_i32_0 = arith.constant 0 : i32
    %c0_i32_1 = arith.constant 0 : i32
    return %c0_i32, %c0_i32_0 : i32, i32
  }
  func.func @transform_6(%arg0: i32) -> (i32, i32) {
    %c0_i32 = arith.constant 0 : i32
    %c0_i32_0 = arith.constant 0 : i32
    %c0_i32_1 = arith.constant 0 : i32
    return %c0_i32, %c0_i32_0 : i32, i32
  }
  func.func @transform_7(%arg0: i32) -> (i32, i32) {
    %c0_i32 = arith.constant 0 : i32
    %c0_i32_0 = arith.constant 0 : i32
    return %c0_i32, %arg0 : i32, i32
  }
}

</mosaic_0001>

<bundles_post_ra>
// kernel: tpu_custom_call.1
= control target key start
LH: loop header
LB: loop body
LE: loop exit
PB: predicated region body
PF: predicated region fallthrough
CT: control target
= control target key end

     0   :  { %s1157_s0 = inlined_call_operand.vmem [shape: f32[1,128], index: 0, kind: input, shape index: {}]   ;;  %s1158_s1 = inlined_call_operand.vmem [shape: f32[128,1], index: 1, kind: input, shape index: {}]   ;;  %s1159_s2 = inlined_call_operand.vmem [shape: f32[128,1], index: 2, kind: input, shape index: {}]   ;;  %s1160_s3 = inlined_call_operand.vmem [shape: f32[128,128], index: 3, kind: input, shape index: {}]   ;;  %s1161_s4 = inlined_call_operand.vmem [shape: f32[128,1], index: 4, kind: input, shape index: {}]   ;;  %s1162_s5 = inlined_call_operand.vmem [shape: f32[1,128], index: 5, kind: input, shape index: {}]   ;;  %s1163_s6 = inlined_call_operand.<no memory space> [shape: f32[1,1], index: 6, kind: input, shape index: {}]   ;;  %s1164_s7 = inlined_call_operand.hbm [shape: f32[1,128], index: 7, kind: output, shape index: {}]  }
   0x1   :  { %v12_v0 = vstv %s1163_s6 }
   0x2   :  { %13 = vst [vmem:[#allocation2] sm:$0x1] %v12_v0 }
   0x3   :  { %v46_v1 = vld [vmem:[%s1159_s2] sm:$0xff]  ;;  %v873_v3 = vmov 0   ;;  %v47_v4 = vld [vmem:[%s1159_s2 + $0x8] sm:$0xff]  ;;  %v33_v6 = vld [vmem:[%s1158_s1 + $0x18] sm:$0xff] }
   0x4   :  { %v30_v2 = vld [vmem:[%s1158_s1] sm:$0xff]  ;;  %848 = vset.pattern.permute.xlu1 %v873_v3  ;;  %847 = vset.pattern.permute.xlu0 %v873_v3  ;;  %v31_v5 = vld [vmem:[%s1158_s1 + $0x8] sm:$0xff]  ;;  %v32_v7 = vld [vmem:[%s1158_s1 + $0x10] sm:$0xff] }
   0x5   :  { %166 = vperm.xlu1 %848, %v46_v1   ;;  %64 = vperm.xlu0 %847, %v30_v2   ;;  %v49_v8 = vld [vmem:[%s1159_s2 + $0x18] sm:$0xff]  ;;  %v48_v9 = vld [vmem:[%s1159_s2 + $0x10] sm:$0xff]  ;;  %v35_v10 = vld [vmem:[%s1158_s1 + $0x28] sm:$0xff] }
   0x6   :  { %v34_v11 = vld [vmem:[%s1158_s1 + $0x20] sm:$0xff] }
   0x9   :  { %171 = vperm.xlu1 %848, %v47_v4   ;;  %69 = vperm.xlu0 %847, %v31_v5  }
   0xd   :  { %79 = vperm.xlu1 %848, %v33_v6   ;;  %74 = vperm.xlu0 %847, %v32_v7  }
  0x11   :  { %181 = vperm.xlu1 %848, %v49_v8   ;;  %176 = vperm.xlu0 %847, %v48_v9  }
  0x12   :  { %14 = vsyncpa [#allocation4], 0  ;;  %v51_v12 = vld [vmem:[%s1159_s2 + $0x28] sm:$0xff]  ;;  %v50_v13 = vld [vmem:[%s1159_s2 + $0x20] sm:$0xff]  ;;  %vm875_vm0 = vmmov 0   ;;  %s877_s27 = smov [#allocation3]  }
  0x13   :  { %v37_v14 = vld [vmem:[%s1158_s1 + $0x38] sm:$0xff]  ;;  %v36_v15 = vld [vmem:[%s1158_s1 + $0x30] sm:$0xff]  ;;  %v39_v18 = vld [vmem:[%s1158_s1 + $0x48] sm:$0xff]  ;;  %s637_s28 = sshll.u32 %s877_s27, 4  ;;  %s638_s28 = int_to_ptr.vmem [resolvable:$true] %s637_s28 }
  0x14   :  { %v53_v16 = vld [vmem:[%s1159_s2 + $0x38] sm:$0xff]  ;;  %v52_v17 = vld [vmem:[%s1159_s2 + $0x30] sm:$0xff]  ;;  %v38_v19 = vld [vmem:[%s1158_s1 + $0x40] sm:$0xff]  ;;  %s849_s29 = scalar_lea.vmem %s638_s28, 16  ;;  %s853_s30 = scalar_lea.vmem %s638_s28, 32 }
  0x15   :  { %89 = vperm.xlu1 %848, %v35_v10   ;;  %84 = vperm.xlu0 %847, %v34_v11   ;;  %v55_v20 = vld [vmem:[%s1159_s2 + $0x48] sm:$0xff]  ;;  %v54_v21 = vld [vmem:[%s1159_s2 + $0x40] sm:$0xff]  ;;  %v41_v22 = vld [vmem:[%s1158_s1 + $0x58] sm:$0xff]  ;;  %p850_p0 = scmp.ne.s32.totalorder %s638_s28, %s849_s29  ;;  %p854_p1 = scmp.lt.s32.totalorder %s638_s28, %s638_s28 }
  0x16   :  { %v40_v23 = vld [vmem:[%s1158_s1 + $0x50] sm:$0xff]  ;;  %v57_v24 = vld [vmem:[%s1159_s2 + $0x58] sm:$0xff]  ;;  %v43_v26 = vld [vmem:[%s1158_s1 + $0x68] sm:$0xff]  ;;  %p855_p2 = scmp.lt.s32.totalorder %s853_s30, %s849_s29 }
  0x17   :  { %v56_v25 = vld [vmem:[%s1159_s2 + $0x50] sm:$0xff]  ;;  %v42_v27 = vld [vmem:[%s1158_s1 + $0x60] sm:$0xff]  ;;  %v59_v28 = vld [vmem:[%s1159_s2 + $0x68] sm:$0xff] }
  0x18   :  { %v58_v29 = vld [vmem:[%s1159_s2 + $0x60] sm:$0xff]  ;;  %v45_v30 = vld [vmem:[%s1158_s1 + $0x78] sm:$0xff]  ;;  %v44_v31 = vld [vmem:[%s1158_s1 + $0x70] sm:$0xff]  ;;  %p856_p3 = por %p855_p2, %p854_p1 }
  0x19   :  { %191 = vperm.xlu1 %848, %v51_v12   ;;  %186 = vperm.xlu0 %847, %v50_v13   ;;  %v61_v32 = vld [vmem:[%s1159_s2 + $0x78] sm:$0xff]  ;;  %v60_v33 = vld [vmem:[%s1159_s2 + $0x70] sm:$0xff]  ;;  %v293_v34 = vld [vmem:[%s1161_s4 + $0x8] sm:$0xff] }
  0x1a   :  { %v292_v35 = vld [vmem:[%s1161_s4] sm:$0xff]  ;;  %v295_v36 = vld [vmem:[%s1161_s4 + $0x18] sm:$0xff]  ;;  %v294_v37 = vld [vmem:[%s1161_s4 + $0x10] sm:$0xff]  ;;  %p857_p4 = pnand %p856_p3, %p850_p0 }
  0x1b   :  { %v276_v38 = vld [vmem:[%s1160_s3] sm:$0xff]  ;;  %v297_v39 = vld [vmem:[%s1161_s4 + $0x28] sm:$0xff]  ;;  %v299_v41 = vld [vmem:[%s1161_s4 + $0x38] sm:$0xff] }
  0x1c   :  { %v296_v40 = vld [vmem:[%s1161_s4 + $0x20] sm:$0xff]  ;;  %727 = vmatprep.mubr.f32.mxu0 %v276_v38  ;;  %v298_v42 = vld [vmem:[%s1161_s4 + $0x30] sm:$0xff]  ;;  %v301_v43 = vld [vmem:[%s1161_s4 + $0x48] sm:$0xff] }
  0x1d   :  { %99 = vperm.xlu1 %848, %v37_v14   ;;  %94 = vperm.xlu0 %847, %v36_v15   ;;  %v300_v44 = vld [vmem:[%s1161_s4 + $0x40] sm:$0xff]  ;;  %v303_v45 = vld [vmem:[%s1161_s4 + $0x58] sm:$0xff]  ;;  %v302_v46 = vld [vmem:[%s1161_s4 + $0x50] sm:$0xff] }
  0x1e   :  { %v305_v47 = vld [vmem:[%s1161_s4 + $0x68] sm:$0xff]  ;;  %v304_v48 = vld [vmem:[%s1161_s4 + $0x60] sm:$0xff]  ;;  %v307_v49 = vld [vmem:[%s1161_s4 + $0x78] sm:$0xff] }
  0x1f   :  { %v306_v50 = vld [vmem:[%s1161_s4 + $0x70] sm:$0xff]  ;;  %v550_v51 = vld [vmem:[#allocation2] sm:$0x1] }
  0x20   :  { %v1071_v52 = vld [vmem:[%s1157_s0] ss:$0 sm:$0xff] }
  0x21   :  { %201 = vperm.xlu1 %848, %v53_v16   ;;  %196 = vperm.xlu0 %847, %v52_v17  }
  0x25   :  { %109 = vperm.xlu1 %848, %v39_v18   ;;  %104 = vperm.xlu0 %847, %v38_v19  }
  0x29   :  { %211 = vperm.xlu1 %848, %v55_v20   ;;  %206 = vperm.xlu0 %847, %v54_v21  }
  0x2d   :  { %119 = vperm.xlu1 %848, %v41_v22   ;;  %114 = vperm.xlu0 %847, %v40_v23  }
  0x31   :  { %221 = vperm.xlu1 %848, %v57_v24   ;;  %216 = vperm.xlu0 %847, %v56_v25  }
  0x35   :  { %129 = vperm.xlu1 %848, %v43_v26   ;;  %124 = vperm.xlu0 %847, %v42_v27  }
  0x39   :  { %231 = vperm.xlu1 %848, %v59_v28   ;;  %226 = vperm.xlu0 %847, %v58_v29  }
  0x3d   :  { %139 = vperm.xlu1 %848, %v45_v30   ;;  %134 = vperm.xlu0 %847, %v44_v31  }
  0x41   :  { %241 = vperm.xlu1 %848, %v61_v32   ;;  %236 = vperm.xlu0 %847, %v60_v33  }
  0x45   :  { %315 = vperm.xlu1 %848, %v293_v34   ;;  %310 = vperm.xlu0 %847, %v292_v35  }
  0x49   :  { %325 = vperm.xlu1 %848, %v295_v36   ;;  %320 = vperm.xlu0 %847, %v294_v37  }
  0x4d   :  { %335 = vperm.xlu1 %848, %v297_v39   ;;  %330 = vperm.xlu0 %847, %v296_v40  }
  0x51   :  { %345 = vperm.xlu1 %848, %v299_v41   ;;  %340 = vperm.xlu0 %847, %v298_v42  }
  0x55   :  { %355 = vperm.xlu1 %848, %v301_v43   ;;  %350 = vperm.xlu0 %847, %v300_v44  }
  0x59   :  { %365 = vperm.xlu1 %848, %v303_v45   ;;  %360 = vperm.xlu0 %847, %v302_v46  }
  0x5d   :  { %375 = vperm.xlu1 %848, %v305_v47   ;;  %370 = vperm.xlu0 %847, %v304_v48  }
  0x61   :  { %385 = vperm.xlu1 %848, %v307_v49   ;;  %380 = vperm.xlu0 %847, %v306_v50  }
  0x65   :  { %553 = vperm.xlu0 %847, %v550_v51  }
  0x84   :  { %v167_v53 = vpop.permute.xlu1 %166  ;;  %v65_v54 = vpop.permute.xlu0 %64 }
  0x85   :  { %v148_v55 = vmul.f32 %v1071_v52, %v65_v54 }
  0x87   :  { %v244_v58 = vadd.f32 %v167_v53, %v148_v55 }
  0x88   :  { %v172_v56 = vpop.permute.xlu1 %171  ;;  %v70_v57 = vpop.permute.xlu0 %69 }
  0x89   :  { %v149_v59 = vmul.f32 %v1071_v52, %v70_v57  ;;  %v260_v63 = vmax.f32 %v244_v58, 0.0 }
  0x8b   :  { %v245_v60 = vadd.f32 %v172_v56, %v149_v59 }
  0x8c   :  { %v80_v61 = vpop.permute.xlu1 %79  ;;  %v75_v62 = vpop.permute.xlu0 %74 }
  0x8d   :  { %v261_v0 = vmax.f32 %v245_v60, 0.0  ;;  %v151_v1 = vmul.f32 %v1071_v52, %v80_v61  ;;  %v150_v2 = vmul.f32 %v1071_v52, %v75_v62 }
  0x8f   :  { %v786_v3 = vpack.c.bf16 %v261_v0, %v260_v63 }
  0x90   :  { %v182_v4 = vpop.permute.xlu1 %181  ;;  %v177_v5 = vpop.permute.xlu0 %176 }
  0x91   :  { %v247_v6 = vadd.f32 %v182_v4, %v151_v1  ;;  %v246_v7 = vadd.f32 %v177_v5, %v150_v2  ;;  %787 = vmatprep.subr.bf16.mxu0 %v786_v3 }
  0x92   :  { %789 = vmatpush3.bf16.msra.mxu0 %v786_v3 }
  0x93   :  { %v263_v8 = vmax.f32 %v247_v6, 0.0  ;;  %v262_v9 = vmax.f32 %v246_v7, 0.0 }
  0x94   :  { %v90_v10 = vpop.permute.xlu1 %89  ;;  %v85_v11 = vpop.permute.xlu0 %84 }
  0x95   :  { %v790_v12 = vpack.c.bf16 %v263_v8, %v262_v9  ;;  %v153_v13 = vmul.f32 %v1071_v52, %v90_v10  ;;  %v152_v14 = vmul.f32 %v1071_v52, %v85_v11 }
  0x97   :  { %791 = vmatprep.subr.bf16.mxu0 %v790_v12 }
  0x98   :  { %v192_v15 = vpop.permute.xlu1 %191  ;;  %v187_v16 = vpop.permute.xlu0 %186  ;;  %793 = vmatpush3.bf16.msra.mxu0 %v790_v12 }
  0x99   :  { %v249_v17 = vadd.f32 %v192_v15, %v153_v13  ;;  %v248_v18 = vadd.f32 %v187_v16, %v152_v14  ;;  %v277_v14 = vld [vmem:[%s1160_s3 + $0x8] sm:$0xff]  ;;  %v278_v15 = vld [vmem:[%s1160_s3 + $0x10] sm:$0xff]  ;;  %v280_v16 = vld [vmem:[%s1160_s3 + $0x20] sm:$0xff] }
  0x9b   :  { %v265_v19 = vmax.f32 %v249_v17, 0.0  ;;  %v264_v20 = vmax.f32 %v248_v18, 0.0  ;;  %v281_v17 = vld [vmem:[%s1160_s3 + $0x28] sm:$0xff]  ;;  %v282_v18 = vld [vmem:[%s1160_s3 + $0x30] sm:$0xff] }
  0x9c   :  { %v100_v21 = vpop.permute.xlu1 %99  ;;  %v95_v22 = vpop.permute.xlu0 %94 }
  0x9d   :  { %v794_v23 = vpack.c.bf16 %v265_v19, %v264_v20  ;;  %v155_v24 = vmul.f32 %v1071_v52, %v100_v21  ;;  %v154_v25 = vmul.f32 %v1071_v52, %v95_v22  ;;  %v283_v19 = vld [vmem:[%s1160_s3 + $0x38] sm:$0xff]  ;;  %v284_v20 = vld [vmem:[%s1160_s3 + $0x40] sm:$0xff]  ;;  %v285_v21 = vld [vmem:[%s1160_s3 + $0x48] sm:$0xff] }
  0x9e   :  { %v286_v22 = vld [vmem:[%s1160_s3 + $0x50] sm:$0xff] }
  0x9f   :  { %795 = vmatprep.subr.bf16.mxu0 %v794_v23 }
  0xa0   :  { %v202_v26 = vpop.permute.xlu1 %201  ;;  %v197_v27 = vpop.permute.xlu0 %196  ;;  %797 = vmatpush3.bf16.msra.mxu0 %v794_v23  ;;  %v287_v23 = vld [vmem:[%s1160_s3 + $0x58] sm:$0xff] }
  0xa1   :  { %v251_v28 = vadd.f32 %v202_v26, %v155_v24  ;;  %v250_v29 = vadd.f32 %v197_v27, %v154_v25  ;;  %v288_v24 = vld [vmem:[%s1160_s3 + $0x60] sm:$0xff]  ;;  %v289_v25 = vld [vmem:[%s1160_s3 + $0x68] sm:$0xff]  ;;  %v290_v26 = vld [vmem:[%s1160_s3 + $0x70] sm:$0xff] }
  0xa2   :  { %v291_v27 = vld [vmem:[%s1160_s3 + $0x78] sm:$0xff] }
  0xa3   :  { %v267_v30 = vmax.f32 %v251_v28, 0.0  ;;  %v266_v31 = vmax.f32 %v250_v29, 0.0  ;;  %v874_v28 = vmov 0.0|0.0   ;;  %v876_v29 = vmov 0.0  }
  0xa4   :  { %v110_v32 = vpop.permute.xlu1 %109  ;;  %v105_v33 = vpop.permute.xlu0 %104  ;;  %818 = vmatprep.subr.bf16.mxu1 %v874_v28  ;;  %783 = vmatprep.mubr.msk.f32.mxu1 %vm875_vm0, %v876_v29 }
  0xa5   :  { %v798_v34 = vpack.c.bf16 %v267_v30, %v266_v31  ;;  %v157_v35 = vmul.f32 %v1071_v52, %v110_v32  ;;  %v156_v36 = vmul.f32 %v1071_v52, %v105_v33 }
  0xa7   :  { %799 = vmatprep.subr.bf16.mxu0 %v798_v34 }
  0xa8   :  { %v212_v37 = vpop.permute.xlu1 %211  ;;  %v207_v38 = vpop.permute.xlu0 %206  ;;  %801 = vmatpush3.bf16.msra.mxu0 %v798_v34 }
  0xa9   :  { %v253_v39 = vadd.f32 %v212_v37, %v157_v35  ;;  %v252_v40 = vadd.f32 %v207_v38, %v156_v36 }
  0xab   :  { %v269_v41 = vmax.f32 %v253_v39, 0.0  ;;  %v268_v42 = vmax.f32 %v252_v40, 0.0 }
  0xac   :  { %v120_v43 = vpop.permute.xlu1 %119  ;;  %v115_v44 = vpop.permute.xlu0 %114 }
  0xad   :  { %v802_v45 = vpack.c.bf16 %v269_v41, %v268_v42  ;;  %v159_v46 = vmul.f32 %v1071_v52, %v120_v43  ;;  %v158_v47 = vmul.f32 %v1071_v52, %v115_v44 }
  0xaf   :  { %803 = vmatprep.subr.bf16.mxu0 %v802_v45 }
  0xb0   :  { %v222_v48 = vpop.permute.xlu1 %221  ;;  %v217_v49 = vpop.permute.xlu0 %216  ;;  %805 = vmatpush3.bf16.msra.mxu0 %v802_v45 }
  0xb1   :  { %v255_v50 = vadd.f32 %v222_v48, %v159_v46  ;;  %v254_v51 = vadd.f32 %v217_v49, %v158_v47 }
  0xb3   :  { %v271_v53 = vmax.f32 %v255_v50, 0.0  ;;  %v270_v54 = vmax.f32 %v254_v51, 0.0 }
  0xb4   :  { %v130_v55 = vpop.permute.xlu1 %129  ;;  %v125_v56 = vpop.permute.xlu0 %124 }
  0xb5   :  { %v806_v57 = vpack.c.bf16 %v271_v53, %v270_v54  ;;  %v161_v58 = vmul.f32 %v1071_v52, %v130_v55  ;;  %v160_v59 = vmul.f32 %v1071_v52, %v125_v56 }
  0xb7   :  { %807 = vmatprep.subr.bf16.mxu0 %v806_v57 }
  0xb8   :  { %v232_v60 = vpop.permute.xlu1 %231  ;;  %v227_v61 = vpop.permute.xlu0 %226  ;;  %809 = vmatpush3.bf16.msra.mxu0 %v806_v57 }
  0xb9   :  { %v257_v62 = vadd.f32 %v232_v60, %v161_v58  ;;  %v256_v63 = vadd.f32 %v227_v61, %v160_v59 }
  0xbb   :  { %v273_v0 = vmax.f32 %v257_v62, 0.0  ;;  %v272_v1 = vmax.f32 %v256_v63, 0.0 }
  0xbc   :  { %v140_v2 = vpop.permute.xlu1 %139  ;;  %v135_v3 = vpop.permute.xlu0 %134 }
  0xbd   :  { %v810_v4 = vpack.c.bf16 %v273_v0, %v272_v1  ;;  %v163_v5 = vmul.f32 %v1071_v52, %v140_v2  ;;  %v162_v6 = vmul.f32 %v1071_v52, %v135_v3  ;;  %v279_v52 = vld [vmem:[%s1160_s3 + $0x18] sm:$0xff] }
  0xbf   :  { %811 = vmatprep.subr.bf16.mxu0 %v810_v4 }
  0xc0   :  { %v242_v7 = vpop.permute.xlu1 %241  ;;  %v237_v8 = vpop.permute.xlu0 %236  ;;  %813 = vmatpush3.bf16.msra.mxu0 %v810_v4 }
  0xc1   :  { %v259_v9 = vadd.f32 %v242_v7, %v163_v5  ;;  %v258_v10 = vadd.f32 %v237_v8, %v162_v6 }
  0xc3   :  { %v275_v11 = vmax.f32 %v259_v9, 0.0  ;;  %v274_v12 = vmax.f32 %v258_v10, 0.0 }
  0xc4   :  { %v316_v30 = vpop.permute.xlu1 %315  ;;  %v311_v31 = vpop.permute.xlu0 %310 }
  0xc5   :  { %v814_v13 = vpack.c.bf16 %v275_v11, %v274_v12 }
  0xc7   :  { %815 = vmatprep.subr.bf16.mxu0 %v814_v13 }
  0xc8   :  { %817 = vmatpush3.bf16.msra.mxu0 %v814_v13  ;;  %v326_v32 = vpop.permute.xlu1 %325  ;;  %v321_v33 = vpop.permute.xlu0 %320 }
  0xcb   :  { %728 = vmatmul.mubr.f32.vlgmr.msra.gmra.mrb[0].mxu0 %v277_v14 }
  0xcc   :  { %730 = vmatprep.mubr.f32.mxu0 %v278_v15  ;;  %v336_v34 = vpop.permute.xlu1 %335  ;;  %v331_v35 = vpop.permute.xlu0 %330 }
  0xcf   :  { %731 = vmatmul.mubr.f32.gmra.mrb[2].mxu0 %v279_v52 }
  0xd0   :  { %733 = vmatprep.mubr.f32.mxu0 %v280_v16  ;;  %v346_v41 = vpop.permute.xlu1 %345  ;;  %v341_v44 = vpop.permute.xlu0 %340 }
  0xd3   :  { %734 = vmatmul.mubr.f32.gmra.mrb[4].mxu0 %v281_v17 }
  0xd4   :  { %736 = vmatprep.mubr.f32.mxu0 %v282_v18  ;;  %v356_v55 = vpop.permute.xlu1 %355  ;;  %v351_v58 = vpop.permute.xlu0 %350 }
  0xd7   :  { %737 = vmatmul.mubr.f32.gmra.mrb[6].mxu0 %v283_v19 }
  0xd8   :  { %739 = vmatprep.mubr.f32.mxu0 %v284_v20  ;;  %v366_v3 = vpop.permute.xlu1 %365  ;;  %v361_v6 = vpop.permute.xlu0 %360 }
  0xdb   :  { %740 = vmatmul.mubr.f32.gmra.mrb[8].mxu0 %v285_v21 }
  0xdc   :  { %742 = vmatprep.mubr.f32.mxu0 %v286_v22  ;;  %v376_v52 = vpop.permute.xlu1 %375  ;;  %v371_v18 = vpop.permute.xlu0 %370 }
  0xdf   :  { %743 = vmatmul.mubr.f32.gmra.mrb[10].mxu0 %v287_v23 }
  0xe0   :  { %745 = vmatprep.mubr.f32.mxu0 %v288_v24 }
  0xe3   :  { %746 = vmatmul.mubr.f32.gmra.mrb[12].mxu0 %v289_v25 }
  0xe4   :  { %748 = vmatprep.mubr.f32.mxu0 %v290_v26 }
  0xe7   :  { %749 = vmatmul.mubr.f32.gmra.mrb[14].mxu0 %v291_v27  ;;  %v386_v27 = vpop.permute.xlu1 %385 }
 0x19e   :  { %v729_v36 = vpop.f32.mrb[0].mxu0 }
 0x19f   :  { %v460_v37 = vadd.f32 %v729_v36, %v316_v30  ;;  %v454_v38 = vpop.f32.mrb[1].mxu0 }
 0x1a0   :  { %v455_v39 = vadd.f32 %v454_v38, %v311_v31  ;;  %v381_v31 = vpop.permute.xlu0 %380 }
 0x1a1   :  { %v534_v40 = vmax.f32 %v460_v37, 0.0 }
 0x1a2   :  { %v533_v42 = vmax.f32 %v455_v39, 0.0  ;;  %v732_v43 = vpop.f32.mrb[2].mxu0  ;;  %v549_v39 = vld [vmem:[%s1162_s5] sm:$0x1] }
 0x1a3   :  { %v470_v45 = vadd.f32 %v732_v43, %v326_v32  ;;  %v464_v46 = vpop.f32.mrb[3].mxu0 }
 0x1a4   :  { %v465_v47 = vadd.f32 %v464_v46, %v321_v33  ;;  %v819_v48 = vpack.c.bf16 %v534_v40, %v533_v42  ;;  %v556_v40 = vlaneseq  ;;  %v554_v43 = vpop.permute.xlu0 %553 }
 0x1a5   :  { %v536_v49 = vmax.f32 %v470_v45, 0.0 }
 0x1a6   :  { %v535_v50 = vmax.f32 %v465_v47, 0.0  ;;  %v735_v51 = vpop.f32.mrb[4].mxu0  ;;  %820 = vmatpush3.bf16.msra.mxu1 %v819_v48 }
 0x1a7   :  { %v480_v53 = vadd.f32 %v735_v51, %v336_v34  ;;  %v474_v54 = vpop.f32.mrb[5].mxu0  ;;  %821 = vmatprep.subr.bf16.mxu1 %v874_v28 }
 0x1a8   :  { %v822_v56 = vpack.c.bf16 %v536_v49, %v535_v50  ;;  %v475_v57 = vadd.f32 %v474_v54, %v331_v35 }
 0x1a9   :  { %v538_v59 = vmax.f32 %v480_v53, 0.0 }
 0x1aa   :  { %v537_v60 = vmax.f32 %v475_v57, 0.0  ;;  %v738_v61 = vpop.f32.mrb[6].mxu0  ;;  %823 = vmatpush3.bf16.msra.mxu1 %v822_v56 }
 0x1ab   :  { %v490_v62 = vadd.f32 %v738_v61, %v346_v41  ;;  %v484_v63 = vpop.f32.mrb[7].mxu0  ;;  %824 = vmatprep.subr.bf16.mxu1 %v874_v28  ;;  %v557_v41 = vshrl.u32 %v556_v40, 7 }
 0x1ac   :  { %v825_v0 = vpack.c.bf16 %v538_v59, %v537_v60  ;;  %v485_v1 = vadd.f32 %v484_v63, %v341_v44 }
 0x1ad   :  { %v540_v2 = vmax.f32 %v490_v62, 0.0  ;;  %v558_v42 = vsub.s32 0, %v557_v41 }
 0x1ae   :  { %v539_v4 = vmax.f32 %v485_v1, 0.0  ;;  %v741_v5 = vpop.f32.mrb[8].mxu0  ;;  %826 = vmatpush3.bf16.msra.mxu1 %v825_v0 }
 0x1af   :  { %v500_v7 = vadd.f32 %v741_v5, %v356_v55  ;;  %v494_v8 = vpop.f32.mrb[9].mxu0  ;;  %827 = vmatprep.subr.bf16.mxu1 %v874_v28  ;;  %v559_v44 = vrot.slane %v554_v43, %v558_v42 }
 0x1b0   :  { %v828_v9 = vpack.c.bf16 %v540_v2, %v539_v4  ;;  %v495_v10 = vadd.f32 %v494_v8, %v351_v58 }
 0x1b1   :  { %v542_v11 = vmax.f32 %v500_v7, 0.0 }
 0x1b2   :  { %v541_v12 = vmax.f32 %v495_v10, 0.0  ;;  %v744_v13 = vpop.f32.mrb[10].mxu0  ;;  %829 = vmatpush3.bf16.msra.mxu1 %v828_v9 }
 0x1b3   :  { %v510_v14 = vadd.f32 %v744_v13, %v366_v3  ;;  %v504_v15 = vpop.f32.mrb[11].mxu0  ;;  %830 = vmatprep.subr.bf16.mxu1 %v874_v28 }
 0x1b4   :  { %v831_v16 = vpack.c.bf16 %v542_v11, %v541_v12  ;;  %v505_v17 = vadd.f32 %v504_v15, %v361_v6 }
 0x1b5   :  { %v544_v19 = vmax.f32 %v510_v14, 0.0 }
 0x1b6   :  { %v543_v20 = vmax.f32 %v505_v17, 0.0  ;;  %v747_v21 = vpop.f32.mrb[12].mxu0  ;;  %832 = vmatpush3.bf16.msra.mxu1 %v831_v16 }
 0x1b7   :  { %v520_v22 = vadd.f32 %v747_v21, %v376_v52  ;;  %v514_v23 = vpop.f32.mrb[13].mxu0  ;;  %833 = vmatprep.subr.bf16.mxu1 %v874_v28 }
 0x1b8   :  { %v834_v24 = vpack.c.bf16 %v544_v19, %v543_v20  ;;  %v515_v25 = vadd.f32 %v514_v23, %v371_v18 }
 0x1b9   :  { %v546_v26 = vmax.f32 %v520_v22, 0.0 }
 0x1ba   :  { %v545_v29 = vmax.f32 %v515_v25, 0.0  ;;  %v750_v30 = vpop.f32.mrb[14].mxu0  ;;  %835 = vmatpush3.bf16.msra.mxu1 %v834_v24 }
 0x1bb   :  { %v530_v32 = vadd.f32 %v750_v30, %v386_v27  ;;  %v524_v33 = vpop.f32.mrb[15].mxu0  ;;  %836 = vmatprep.subr.bf16.mxu1 %v874_v28 }
 0x1bc   :  { %v837_v34 = vpack.c.bf16 %v546_v26, %v545_v29  ;;  %v525_v35 = vadd.f32 %v524_v33, %v381_v31 }
 0x1bd   :  { %v548_v36 = vmax.f32 %v530_v32, 0.0 }
 0x1be   :  { %v547_v37 = vmax.f32 %v525_v35, 0.0  ;;  %838 = vmatpush3.bf16.msra.mxu1 %v837_v34 }
 0x1bf   :  { %839 = vmatprep.subr.bf16.mxu1 %v874_v28 }
 0x1c0   :  { %v840_v38 = vpack.c.bf16 %v548_v36, %v547_v37 }
 0x1c2   :  { %841 = vmatpush3.bf16.msra.mxu1 %v840_v38 }
 0x1c5   :  { %784 = vmatmul.mubr.f32.vlgmr.msra.gmra.mrb[0].mxu1 %v549_v39 }
 0x298   :  { %v626_v45 = vpop.f32.mrb[0].mxu1 }
 0x299   :  { %v627_v46 = vadd.f32 %v626_v45, %v559_v44  ;;  %v785_v47 = vpop.f32.mrb[1].mxu1 }
 0x29b   :  { %630 = vst [vmem:[#allocation3] sm:$0x1] %v627_v46 }
 0x29c   :  { %860 = shalt.err (!%p857_p4)
}
 0x29d   :  { %s861_s9 = scalar_lea.hbm %s1164_s7, 16 }
 0x29e   :  { %p862_p5 = scmp.ne.s32.totalorder %s1164_s7, %s861_s9  ;;  %p865_p6 = scmp.lt.u32.totalorder %s861_s9, %s1164_s7 }
 0x2a0   :  { %p867_p7 = pnand %p865_p6, %p862_p5 }
 0x2a2   :  { %870 = shalt.err (!%p867_p7)
}
 0x2a3   :  { %640 = dma.vmem_to_hbm [thread:$0]  %s638_s28, 16, %s1164_s7, [#allocation4]  }
 0x2a4   :  { %871 = dma.done.wait [#allocation4], 16  }
 0x2a5   :  { %872 = vsyncadd [#allocation4], 4294967280 }
 0x2a6   :  { %644 = vsyncpa [#allocation4], 1 }

</bundles_post_ra>
